<compile_context>
chip_gen: v5e
topology: v5e:2x2
jax: 0.10.0
libtpu: 0.0.40
codegen_flags: <defaults>
</compile_context>

<pallas_src>
import jax
import jax.numpy as jnp
from jax import lax
from jax.experimental import pallas as pl
from jax.experimental.pallas import tpu as pltpu


def _round_up(x, m):
    return ((x + m - 1) // m) * m


# Tile caps.  Worst-case working set (tm=256, tn=512, tk=2048, f32):
#   2*(tm*tk + tn*tk + tm*tn + tn)*4B + acc ~= 13.5 MiB  -> fits the explicit
#   vmem_limit we set below on every generation (v5e/v6e/v7x).
_MAX_TK = 2048   # reduction (input_size) tile
_MAX_TN = 512    # output (hash_code_length) tile, multiple of 256
_MAX_TM = 256    # batch-row tile


def _hashing_kernel_multi_k(x_ref, w_ref, b_ref, o_ref, acc_ref):
    """One (M-tile, N-tile, K-tile) grid step of tanh(x @ W^T + b).

    x_ref   : (tm, tk)       activations (f32 or bf16)
    w_ref   : (tn, tk)       weight in native (out, in) layout -> trans_b
    b_ref   : (1, tn)        bias (f32)
    o_ref   : (tm, tn)       output tile
    acc_ref : (tm, tn) f32   VMEM accumulator, persists across the K axis
    """
    k = pl.program_id(2)

    @pl.when(k == 0)
    def _():
        acc_ref[...] = jnp.zeros_like(acc_ref)

    # Contract the last dim of both operands (== x @ W^T); f32 MXU accumulation.
    acc_ref[...] += lax.dot_general(
        x_ref[...], w_ref[...],
        dimension_numbers=(((1,), (1,)), ((), ())),
        preferred_element_type=jnp.float32)

    @pl.when(k == pl.num_programs(2) - 1)
    def _():
        o_ref[...] = jnp.tanh(acc_ref[...] + b_ref[...]).astype(o_ref.dtype)


def _hashing_kernel_single_k(x_ref, w_ref, b_ref, o_ref):
    """Fast path: the whole reduction fits one K block -> no accumulator."""
    acc = lax.dot_general(
        x_ref[...], w_ref[...],
        dimension_numbers=(((1,), (1,)), ((), ())),
        preferred_element_type=jnp.float32)
    o_ref[...] = jnp.tanh(acc + b_ref[...]).astype(o_ref.dtype)


def prepare_hashing_params(weight, bias, *, compute_dtype=jnp.float32,
                           max_tk=_MAX_TK):
    """One-time parameter preparation (outside the per-call hot path).

    - keeps the weight in its native (hash_code_length, input_size) layout,
    - optionally casts it to bf16 (halves the memory-bound HBM weight stream),
    - zero-pads N up to a multiple of 256 (fills the 2x256 MXU on v6e/v7x and
      keeps output stores lane-dense) and K up to the K tile when K > max_tk.
      When K <= max_tk the K axis is left at its exact width (single block,
      no per-call x padding needed).
    """
    N, K = weight.shape

    if K <= max_tk:
        tk, k_pad = K, K               # single exact-width K block
    else:
        tk = max_tk
        k_pad = _round_up(K, tk)

    n_pad = _round_up(N, 256)
    tn = _MAX_TN if n_pad % _MAX_TN == 0 else 256

    w = jnp.zeros((n_pad, k_pad), compute_dtype).at[:N, :K].set(
        weight.astype(compute_dtype))
    b = jnp.zeros((1, n_pad), jnp.float32).at[0, :N].set(
        bias.astype(jnp.float32))

    # TODO(synk): int8 weight storage on v5e/v6e and fp8 on v7x (per-output-
    # channel scales folded into the pre-tanh epilogue) would further halve
    # the weight stream; not implemented here.
    meta = dict(N=N, K=K, n_pad=n_pad, k_pad=k_pad, tn=tn, tk=tk,
                compute_dtype=compute_dtype)
    return w, b, meta


def _hashing_matmul(x2d, w_prepared, b_prepared, meta, *,
                    out_dtype=jnp.float32, unpad=True):
    """tanh(x2d @ W^T + b) for x2d of shape (M, input_size)."""
    M, K = x2d.shape
    assert K == meta["K"], "x rows must have length input_size"
    n_pad, k_pad, tn, tk = meta["n_pad"], meta["k_pad"], meta["tn"], meta["tk"]
    cdt = meta["compute_dtype"]

    x2d = x2d.astype(cdt)
    # Only pad K when multiple K blocks are needed and K is not a tile
    # multiple (rare).  W's padded K columns are zero, so padding is inert.
    if k_pad != K:
        x2d = jnp.pad(x2d, ((0, 0), (0, k_pad - K)))

    # M tiling: small batches use a single exact-size M block (no pad);
    # large batches are tiled at _MAX_TM rows to bound VMEM.
    if M <= _MAX_TM:
        tm, m_pad = M, M
    else:
        tm = _MAX_TM
        m_pad = _round_up(M, tm)
        if m_pad != M:
            x2d = jnp.pad(x2d, ((0, m_pad - M), (0, 0)))

    mt, nt, kt = m_pad // tm, n_pad // tn, k_pad // tk

    # Explicit VMEM budget: double-buffered x/W/bias/out blocks (+ f32 acc
    # when K is tiled), floored at the 32 MiB scoped default (raises v5e's
    # 16 MiB default) and capped at 48 MiB (under v7x's 64 MiB physical VMEM).
    in_b = jnp.dtype(cdt).itemsize
    out_b = jnp.dtype(out_dtype).itemsize
    budget = 2 * (tm * tk * in_b + tn * tk * in_b + tn * 4 + tm * tn * out_b)
    if kt > 1:
        budget += tm * tn * 4
    vmem_limit = int(min(48 << 20, max(32 << 20, budget + (4 << 20))))

    if kt == 1:
        grid = (mt, nt)
        kernel = _hashing_kernel_single_k
        in_specs = [
            pl.BlockSpec((tm, tk), lambda m, n: (m, 0)),    # x
            pl.BlockSpec((tn, tk), lambda m, n: (n, 0)),    # W (out, in)
            pl.BlockSpec((1, tn), lambda m, n: (0, n)),     # bias
        ]
        out_spec = pl.BlockSpec((tm, tn), lambda m, n: (m, n))
        scratch = []
        dims = ("parallel", "parallel")
    else:
        grid = (mt, nt, kt)                                  # K last
        kernel = _hashing_kernel_multi_k
        in_specs = [
            pl.BlockSpec((tm, tk), lambda m, n, k: (m, k)),  # x
            pl.BlockSpec((tn, tk), lambda m, n, k: (n, k)),  # W (out, in)
            pl.BlockSpec((1, tn), lambda m, n, k: (0, n)),   # bias
        ]
        out_spec = pl.BlockSpec((tm, tn), lambda m, n, k: (m, n))
        scratch = [pltpu.VMEM((tm, tn), jnp.float32)]
        dims = ("parallel", "parallel", "arbitrary")

    out = pl.pallas_call(
        kernel,
        out_shape=jax.ShapeDtypeStruct((m_pad, n_pad), out_dtype),
        grid_spec=pltpu.PrefetchScalarGridSpec(
            num_scalar_prefetch=0,
            grid=grid,
            in_specs=in_specs,
            out_specs=out_spec,
            scratch_shapes=scratch,
        ),
        compiler_params=pltpu.CompilerParams(
            dimension_semantics=dims,
            vmem_limit_bytes=vmem_limit),
    )(x2d, w_prepared, b_prepared)

    if unpad:
        out = out[:M, :meta["N"]]
    elif m_pad != M:
        out = out[:M]
    return out


def hashing_layer_forward(x, w_prepared, b_prepared, meta):
    """Single-vector forward, mirroring HashingLayer.forward(x)."""
    input_size = meta["K"]
    n = x.shape[0]
    if n < input_size:
        # Same semantics as x.repeat(input_size)[:input_size], but only
        # materializes ceil(input_size/n) copies instead of input_size copies.
        # TODO(synk): fuse this periodic repeat into the kernel (modulo-K
        # indexing of the short x) instead of materializing the tiled copy.
        x = jnp.tile(x, (input_size + n - 1) // n)
    if x.shape[0] > input_size:
        x = x[:input_size]
    return _hashing_matmul(x[None, :], w_prepared, b_prepared, meta)[0]


def hashing_layer_forward_batched(xs, w_prepared, b_prepared, meta, *,
                                  out_dtype=jnp.float32, unpad=True):
    """Batched forward: xs is (M, input_size); rows reuse each weight tile.

    Pass unpad=False to keep the lane-padded (M, n_pad) output and skip the
    wrapper-side slice (slice / narrow at the consumer instead).
    """
    return _hashing_matmul(xs, w_prepared, b_prepared, meta,
                           out_dtype=out_dtype, unpad=unpad)


if __name__ == "__main__":
    key = jax.random.PRNGKey(0)
    k_w, k_b, k_x, k_xs, k_w2, k_b2, k_x2 = jax.random.split(key, 7)

    # ------------------------------------------------------------------
    # Case 1: small layer (single-K-block fast path), shapes match the module
    # ------------------------------------------------------------------
    input_size = 32
    hash_code_length = 16
    bound = 1.0 / (input_size ** 0.5)
    weight = jax.random.uniform(
        k_w, (hash_code_length, input_size), jnp.float32, -bound, bound)
    bias = jax.random.uniform(
        k_b, (hash_code_length,), jnp.float32, -bound, bound)

    # Input shorter than input_size exercises the repeat/narrow prologue.
    x = jax.random.normal(k_x, (8,), jnp.float32)
    reps = (input_size + x.shape[0] - 1) // x.shape[0]
    x_full = jnp.tile(x, reps)[:input_size]
    y_ref = jnp.tanh(x_full @ weight.T + bias)

    # f32 path (exact match to the PyTorch f32 Linear)
    w32, b32, meta32 = prepare_hashing_params(weight, bias,
                                              compute_dtype=jnp.float32)
    y32 = jax.block_until_ready(hashing_layer_forward(x, w32, b32, meta32))
    assert y32.shape == (hash_code_length,)
    assert jnp.allclose(y32, y_ref, atol=1e-5, rtol=1e-5)

    # bf16-weight path (half the HBM weight traffic, f32 accumulation)
    wbf, bbf, metabf = prepare_hashing_params(weight, bias,
                                              compute_dtype=jnp.bfloat16)
    ybf = jax.block_until_ready(hashing_layer_forward(x, wbf, bbf, metabf))
    assert ybf.shape == (hash_code_length,)
    assert jnp.allclose(ybf, y_ref, atol=5e-2, rtol=5e-2)

    # batched path: many x vectors reuse each weight tile
    xs = jax.random.normal(k_xs, (4, input_size), jnp.float32)
    ys = jax.block_until_ready(
        hashing_layer_forward_batched(xs, w32, b32, meta32))
    ys_ref = jnp.tanh(xs @ weight.T + bias)
    assert ys.shape == (4, hash_code_length)
    assert jnp.allclose(ys, ys_ref, atol=1e-5, rtol=1e-5)

    # batched, padded output kept (no wrapper-side slice traffic)
    ys_pad = jax.block_until_ready(
        hashing_layer_forward_batched(xs, w32, b32, meta32, unpad=False))
    assert ys_pad.shape == (4, meta32["n_pad"])
    assert jnp.allclose(ys_pad[:, :hash_code_length], ys_ref,
                        atol=1e-5, rtol=1e-5)

    # ------------------------------------------------------------------
    # Case 2: exercise the multi-K-block accumulator path at small scale by
    # forcing a smaller K tile (max_tk=128 with input_size=256 -> 2 K blocks).
    # ------------------------------------------------------------------
    input_size2 = 256
    hash_code_length2 = 16
    bound2 = 1.0 / (input_size2 ** 0.5)
    weight2 = jax.random.uniform(
        k_w2, (hash_code_length2, input_size2), jnp.float32, -bound2, bound2)
    bias2 = jax.random.uniform(
        k_b2, (hash_code_length2,), jnp.float32, -bound2, bound2)
    x2 = jax.random.normal(k_x2, (100,), jnp.float32)    # < input_size2
    reps2 = (input_size2 + x2.shape[0] - 1) // x2.shape[0]
    x2_full = jnp.tile(x2, reps2)[:input_size2]
    y2_ref = jnp.tanh(x2_full @ weight2.T + bias2)

    w2p, b2p, meta2 = prepare_hashing_params(weight2, bias2,
                                             compute_dtype=jnp.float32,
                                             max_tk=128)
    assert meta2["k_pad"] // meta2["tk"] == 2   # multi-K path really taken
    y2 = jax.block_until_ready(hashing_layer_forward(x2, w2p, b2p, meta2))
    assert y2.shape == (hash_code_length2,)
    assert jnp.allclose(y2, y2_ref, atol=1e-5, rtol=1e-5)

    print("KERNEL_OK")
</pallas_src>

<mosaic_0001>
module attributes {stable_mosaic.version = 11 : i64} {
  func.func @_hashing_kernel_single_k(%arg0: i32, %arg1: i32, %arg2: memref<1x32xf32, #tpu.memory_space<vmem>>, %arg3: memref<256x32xf32, #tpu.memory_space<vmem>>, %arg4: memref<1x256xf32, #tpu.memory_space<vmem>>, %arg5: memref<1x256xf32, #tpu.memory_space<vmem>>) attributes {dimension_semantics = [#tpu.dimension_semantics<parallel>, #tpu.dimension_semantics<parallel>], iteration_bounds = array<i64: 1, 1>, scalar_prefetch = 0 : i64, scratch_operands = 0 : i64, tpu.core_type = #tpu.core_type<tc>, window_params = [{transform_indices = @transform_0, window_bounds = array<i64: 1, 32>}, {transform_indices = @transform_1, window_bounds = array<i64: 256, 32>}, {transform_indices = @transform_2, window_bounds = array<i64: 1, 256>}, {transform_indices = @transform_3, window_bounds = array<i64: 1, 256>}]} {
    %c0 = arith.constant 0 : index
    %c0_0 = arith.constant 0 : index
    %0 = vector.load %arg2[%c0, %c0_0] : memref<1x32xf32, #tpu.memory_space<vmem>>, vector<1x32xf32>
    %c0_1 = arith.constant 0 : index
    %c0_2 = arith.constant 0 : index
    %1 = vector.load %arg3[%c0_1, %c0_2] : memref<256x32xf32, #tpu.memory_space<vmem>>, vector<256x32xf32>
    %cst = arith.constant dense<0.000000e+00> : vector<1x256xf32>
    %2 = tpu.matmul %0, %1, %cst {dimension_numbers = #tpu.dot_dimension_numbers<[1], [1], [0], [0], [0, 0, 1, 0], [], []>} : vector<1x32xf32>, vector<256x32xf32>, vector<1x256xf32> -> vector<1x256xf32>
    %c0_3 = arith.constant 0 : index
    %c0_4 = arith.constant 0 : index
    %3 = vector.load %arg4[%c0_3, %c0_4] : memref<1x256xf32, #tpu.memory_space<vmem>>, vector<1x256xf32>
    %4 = arith.addf %2, %3 : vector<1x256xf32>
    %5 = math.tanh %4 : vector<1x256xf32>
    %c0_5 = arith.constant 0 : index
    %c0_6 = arith.constant 0 : index
    %6 = vector.load %arg5[%c0_5, %c0_6] : memref<1x256xf32, #tpu.memory_space<vmem>>, vector<1x256xf32>
    tpu.vector_store %arg5[%c0_5, %c0_6], %5 {strides = array<i32>} : memref<1x256xf32, #tpu.memory_space<vmem>>, vector<1x256xf32>,
    return
  }
  func.func @transform_0(%arg0: i32, %arg1: i32) -> (i32, i32) {
    %c0_i32 = arith.constant 0 : i32
    %c0_i32_0 = arith.constant 0 : i32
    return %arg0, %c0_i32 : i32, i32
  }
  func.func @transform_1(%arg0: i32, %arg1: i32) -> (i32, i32) {
    %c0_i32 = arith.constant 0 : i32
    %c0_i32_0 = arith.constant 0 : i32
    return %arg1, %c0_i32 : i32, i32
  }
  func.func @transform_2(%arg0: i32, %arg1: i32) -> (i32, i32) {
    %c0_i32 = arith.constant 0 : i32
    %c0_i32_0 = arith.constant 0 : i32
    return %c0_i32, %arg1 : i32, i32
  }
  func.func @transform_3(%arg0: i32, %arg1: i32) -> (i32, i32) {
    %c0_i32 = arith.constant 0 : i32
    return %arg0, %arg1 : i32, i32
  }
}

</mosaic_0001>

<bundles_post_ra>
// kernel: tpu_custom_call.1
= control target key start
LH: loop header
LB: loop body
LE: loop exit
PB: predicated region body
PF: predicated region fallthrough
CT: control target
= control target key end

     0   :  { %vm54_vm0 = vcmask 261120   ;;  %s448_s0 = inlined_call_operand.vmem [shape: f32[1,32], index: 0, kind: input, shape index: {}]   ;;  %s449_s1 = inlined_call_operand.vmem [shape: f32[256,32], index: 1, kind: input, shape index: {}]   ;;  %s450_s2 = inlined_call_operand.vmem [shape: f32[1,256], index: 2, kind: input, shape index: {}]   ;;  %s451_s3 = inlined_call_operand.hbm [shape: f32[1,256], index: 3, kind: output, shape index: {}]  }
   0x1   :  { %v47_v0 = vld [vmem:[%s449_s1 + $0xf8] sm:$0xff]  ;;  %v46_v2 = vld [vmem:[%s449_s1 + $0xf0] sm:$0xff]  ;;  %v45_v4 = vld [vmem:[%s449_s1 + $0xe8] sm:$0xff] }
   0x2   :  { %v31_v1 = vld [vmem:[%s449_s1 + $0x78] sm:$0xff]  ;;  %240 = vmatpush.xpose.msk.msra.mxu1 %vm54_vm0, %v47_v0  ;;  %v30_v3 = vld [vmem:[%s449_s1 + $0x70] sm:$0xff]  ;;  %v29_v5 = vld [vmem:[%s449_s1 + $0x68] sm:$0xff] }
   0x3   :  { %223 = vmatpush.xpose.msk.msra.mxu0 %vm54_vm0, %v31_v1 }
   0x6   :  { %241 = vmatpush.xpose.msk.msra.mxu1 %vm54_vm0, %v46_v2 }
   0x7   :  { %224 = vmatpush.xpose.msk.msra.mxu0 %vm54_vm0, %v30_v3 }
   0x8   :  { %8 = vsyncpa [#allocation3], 0  ;;  %v44_v6 = vld [vmem:[%s449_s1 + $0xe0] sm:$0xff]  ;;  %v43_v8 = vld [vmem:[%s449_s1 + $0xd8] sm:$0xff]  ;;  %v202_v40 = vlaneseq  ;;  %s214_s28 = sshll.u32 %s451_s3, 4  ;;  %vm199_vm1 = vcmask 1040384   ;;  %s215_s28 = int_to_ptr.hbm [resolvable:$true] %s214_s28 }
   0x9   :  { %v28_v7 = vld [vmem:[%s449_s1 + $0x60] sm:$0xff]  ;;  %v27_v9 = vld [vmem:[%s449_s1 + $0x58] sm:$0xff]  ;;  %v42_v10 = vld [vmem:[%s449_s1 + $0xd0] sm:$0xff] }
   0xa   :  { %242 = vmatpush.xpose.msk.msra.mxu1 %vm54_vm0, %v45_v4  ;;  %v26_v11 = vld [vmem:[%s449_s1 + $0x50] sm:$0xff]  ;;  %v41_v12 = vld [vmem:[%s449_s1 + $0xc8] sm:$0xff]  ;;  %v40_v14 = vld [vmem:[%s449_s1 + $0xc0] sm:$0xff]  ;;  %vm204_vm2 = vcmp.lt.s32.totalorder %v202_v40, 256 }
   0xb   :  { %225 = vmatpush.xpose.msk.msra.mxu0 %vm54_vm0, %v29_v5  ;;  %v25_v13 = vld [vmem:[%s449_s1 + $0x48] sm:$0xff]  ;;  %v24_v15 = vld [vmem:[%s449_s1 + $0x40] sm:$0xff]  ;;  %v39_v16 = vld [vmem:[%s449_s1 + $0xb8] sm:$0xff] }
   0xc   :  { %v23_v17 = vld [vmem:[%s449_s1 + $0x38] sm:$0xff]  ;;  %v38_v18 = vld [vmem:[%s449_s1 + $0xb0] sm:$0xff]  ;;  %v37_v20 = vld [vmem:[%s449_s1 + $0xa8] sm:$0xff] }
   0xd   :  { %v22_v19 = vld [vmem:[%s449_s1 + $0x30] sm:$0xff]  ;;  %v21_v21 = vld [vmem:[%s449_s1 + $0x28] sm:$0xff]  ;;  %v36_v22 = vld [vmem:[%s449_s1 + $0xa0] sm:$0xff] }
   0xe   :  { %243 = vmatpush.xpose.msk.msra.mxu1 %vm54_vm0, %v44_v6  ;;  %v20_v23 = vld [vmem:[%s449_s1 + $0x20] sm:$0xff]  ;;  %v35_v24 = vld [vmem:[%s449_s1 + $0x98] sm:$0xff]  ;;  %v34_v26 = vld [vmem:[%s449_s1 + $0x90] sm:$0xff] }
   0xf   :  { %226 = vmatpush.xpose.msk.msra.mxu0 %vm54_vm0, %v28_v7  ;;  %v19_v25 = vld [vmem:[%s449_s1 + $0x18] sm:$0xff]  ;;  %v18_v27 = vld [vmem:[%s449_s1 + $0x10] sm:$0xff]  ;;  %v33_v28 = vld [vmem:[%s449_s1 + $0x88] sm:$0xff] }
  0x10   :  { %v17_v29 = vld [vmem:[%s449_s1 + $0x8] sm:$0xff]  ;;  %v32_v30 = vld [vmem:[%s449_s1 + $0x80] sm:$0xff] }
  0x11   :  { %v16_v31 = vld [vmem:[%s449_s1] sm:$0xff]  ;;  %s288_s1 = smov [#allocation2]  }
  0x12   :  { %244 = vmatpush.xpose.msk.msra.mxu1 %vm54_vm0, %v43_v8  ;;  %v15_v32 = vld [vmem:[%s448_s0] sm:$0x1]  ;;  %s212_s26 = sshll.u32 %s288_s1, 4  ;;  %s213_s26 = int_to_ptr.vmem [resolvable:$true] %s212_s26 }
  0x13   :  { %227 = vmatpush.xpose.msk.msra.mxu0 %vm54_vm0, %v27_v9  ;;  %v48_v33 = vld [vmem:[%s450_s2] sm:$0x3] }
  0x14   :  { %v51_v34 = vperm.slane %v48_v33, 1  ;;  %v50_v35 = vperm.slane %v48_v33, 0 }
  0x16   :  { %245 = vmatpush.xpose.msk.msra.mxu1 %vm54_vm0, %v42_v10 }
  0x17   :  { %228 = vmatpush.xpose.msk.msra.mxu0 %vm54_vm0, %v26_v11 }
  0x1a   :  { %246 = vmatpush.xpose.msk.msra.mxu1 %vm54_vm0, %v41_v12 }
  0x1b   :  { %229 = vmatpush.xpose.msk.msra.mxu0 %vm54_vm0, %v25_v13 }
  0x1e   :  { %247 = vmatpush.xpose.msk.msra.mxu1 %vm54_vm0, %v40_v14 }
  0x1f   :  { %230 = vmatpush.xpose.msk.msra.mxu0 %vm54_vm0, %v24_v15 }
  0x22   :  { %248 = vmatpush.xpose.msk.msra.mxu1 %vm54_vm0, %v39_v16 }
  0x23   :  { %231 = vmatpush.xpose.msk.msra.mxu0 %vm54_vm0, %v23_v17 }
  0x26   :  { %249 = vmatpush.xpose.msk.msra.mxu1 %vm54_vm0, %v38_v18 }
  0x27   :  { %232 = vmatpush.xpose.msk.msra.mxu0 %vm54_vm0, %v22_v19 }
  0x2a   :  { %250 = vmatpush.xpose.msk.msra.mxu1 %vm54_vm0, %v37_v20 }
  0x2b   :  { %233 = vmatpush.xpose.msk.msra.mxu0 %vm54_vm0, %v21_v21 }
  0x2e   :  { %251 = vmatpush.xpose.msk.msra.mxu1 %vm54_vm0, %v36_v22 }
  0x2f   :  { %234 = vmatpush.xpose.msk.msra.mxu0 %vm54_vm0, %v20_v23 }
  0x32   :  { %252 = vmatpush.xpose.msk.msra.mxu1 %vm54_vm0, %v35_v24 }
  0x33   :  { %235 = vmatpush.xpose.msk.msra.mxu0 %vm54_vm0, %v19_v25 }
  0x36   :  { %253 = vmatpush.xpose.msk.msra.mxu1 %vm54_vm0, %v34_v26 }
  0x37   :  { %236 = vmatpush.xpose.msk.msra.mxu0 %vm54_vm0, %v18_v27 }
  0x3a   :  { %254 = vmatpush.xpose.msk.msra.mxu1 %vm54_vm0, %v33_v28 }
  0x3b   :  { %237 = vmatpush.xpose.msk.msra.mxu0 %vm54_vm0, %v17_v29 }
  0x3e   :  { %255 = vmatpush.xpose.msk.msra.mxu1 %vm54_vm0, %v32_v30 }
  0x3f   :  { %238 = vmatpush.xpose.msk.msra.mxu0 %vm54_vm0, %v16_v31 }
  0x41   :  { %256 = vmatmul.msk.f32.vlgmr.msra.gmra.mxu1 %vm54_vm0, %v15_v32 }
  0x42   :  { %239 = vmatmul.msk.f32.vlgmr.msra.gmra.mxu0 %vm54_vm0, %v15_v32 }
  0xbe   :  { %v191_v36 = vpop.f32.mrf.mxu1 }
  0xbf   :  { %v171_v37 = vpop.f32.mrf.mxu0  ;;  %v192_v38 = vadd.f32 %v191_v36, %v51_v34 }
  0xc0   :  { %v172_v39 = vadd.f32 %v171_v37, %v50_v35 }
  0xc1   :  { %258 = vtanh.f32 %v192_v38 }
  0xc2   :  { %260 = vtanh.f32 %v172_v39 }
  0xc7   :  { %v259_v41 = vpop.eup %258 }
  0xc8   :  { %v261_v42 = vpop.eup %260  ;;  %v198_v43 = vrot.slane %v259_v41, 7 }
  0xca   :  { %v200_v44 = vsel %vm199_vm1, %v261_v42, %v198_v43 }
  0xcb   :  { %206 = vst.msk [vmem:[#allocation2] sm:$0x3] %vm204_vm2, %v200_v44 }
  0xcc   :  { %217 = dma.vmem_to_hbm [thread:$0]  %s213_s26, 32, %s215_s28, [#allocation3]  }
  0xcd   :  { %286 = dma.done.wait [#allocation3], 32  }
  0xce   :  { %287 = vsyncadd [#allocation3], 4294967264 }
  0xcf   :  { %222 = vsyncpa [#allocation3], 1 }

</bundles_post_ra>
